<compile_context>
chip_gen: v7x
topology: tpu7x:2x2x1
jax: 0.10.0
libtpu: 0.0.40
codegen_flags: <defaults>
</compile_context>

<pallas_src>
import functools

import jax
import jax.numpy as jnp
from jax.experimental import pallas as pl
from jax.experimental.pallas import tpu as pltpu


# ---------------------------------------------------------------------------
# Kernels
# ---------------------------------------------------------------------------

def _concat_sublane_kernel(x_ref, row_ref, out_ref):
    # x_ref  : (Gt, M, Nt)    VMEM tile of the input (native dtype)
    # row_ref: (E, Rw)        gathered embedding row, Rw in {1, Nt} (out dtype)
    # out_ref: (Gt, M+E, Nt)  VMEM tile of the output (promoted dtype)
    Gt, M, Nt = x_ref.shape
    E = row_ref.shape[0]
    x = x_ref[...].astype(out_ref.dtype)                       # in-kernel cast
    emb = jnp.broadcast_to(row_ref[...][None, :, :], (Gt, E, Nt))
    # Build the whole tile in registers -> one unmasked full-tile store.
    out_ref[...] = jnp.concatenate((x, emb), axis=1)


def _concat_lane_kernel(x_ref, row_ref, out_ref):
    # x_ref  : (Gt, Mt, N)     VMEM tile of the input (native dtype)
    # row_ref: (Rm, Er)        gathered embedding lanes, Rm in {1, Mt} (out dtype)
    # out_ref: (Gt, Mt, N+Er)  VMEM tile of the output (promoted dtype)
    Gt, Mt, N = x_ref.shape
    Er = row_ref.shape[1]
    x = x_ref[...].astype(out_ref.dtype)                       # in-kernel cast
    emb = jnp.broadcast_to(row_ref[...][None, :, :], (Gt, Mt, Er))
    out_ref[...] = jnp.concatenate((x, emb), axis=2)


# ---------------------------------------------------------------------------
# Generation-aware budgets & tiling heuristics
# ---------------------------------------------------------------------------

_ROW_BCAST_MAX_BYTES = 1 << 20    # pre-broadcast the row only while it's cheap
_LANE_DENSE_MIN = 128             # lane-densify if natural lane extent < 128


@functools.lru_cache(maxsize=None)
def _tpu_budgets():
    """(per-step in+out byte target, explicit vmem_limit_bytes)."""
    vmem_cap = 64 << 20           # conservative fallback (v7x-sized VMEM)
    try:
        info = pltpu.get_tpu_info()
        vmem_cap = int(getattr(info, "vmem_capacity_bytes", vmem_cap) or vmem_cap)
    except Exception:
        pass
    # ~16 MiB/step on 128 MiB-VMEM chips (v5e/v6e), ~8 MiB/step on v7x (64 MiB).
    step_budget = int(min(16 << 20, vmem_cap // 8))
    # Double-buffered blocks (~2x step) + row block + compiler scratch headroom,
    # but never more than the physical capacity minus slack.
    vmem_limit = int(min(vmem_cap - (8 << 20), 2 * step_budget + (16 << 20)))
    return step_budget, vmem_limit


def _pick_group_tile(g, per_group_bytes, step_budget):
    """Block as many leading groups per step as fit the budget (cdiv grid,
    so no divisor search / no collapse for prime-ish G)."""
    return max(1, min(g, step_budget // max(per_group_bytes, 1)))


def _pick_lane_tile(n, per_lane_bytes, step_budget):
    """Full lane extent unless a single group exceeds the per-step budget; then
    a large 128-multiple tile (>= 1024 lanes), preferring an exact divisor."""
    if n <= 1024 or n * per_lane_bytes <= step_budget:
        return n
    max_nt = (step_budget // max(per_lane_bytes, 1)) // 128 * 128
    nt0 = max(min((n // 128) * 128, max_nt), 1024)
    nt = nt0
    while nt >= 1024:
        if n % nt == 0:
            return nt             # divisor -> no masked edge block
        nt -= 128
    return nt0                    # ragged last lane block (cdiv grid handles it)


# ---------------------------------------------------------------------------
# pallas_call wrappers
# ---------------------------------------------------------------------------

def _concat_sublane(x, row):
    """x: (G, M, N) native dtype; row: (E,) promoted dtype.
    Returns (G, M+E, N); the embedding is constant along N."""
    G, M, N = x.shape
    E = row.shape[0]
    out_dtype = row.dtype
    step_budget, vmem_limit = _tpu_budgets()

    isz_in = x.dtype.itemsize
    isz_out = jnp.dtype(out_dtype).itemsize
    per_lane = M * isz_in + (M + E) * isz_out      # in+out bytes per lane column

    Nt = _pick_lane_tile(N, per_lane, step_budget)
    Gt = _pick_group_tile(G, Nt * per_lane, step_budget)
    grid = (pl.cdiv(G, Gt), pl.cdiv(N, Nt))

    # Pre-broadcast the row to the lane-tile width when cheap; otherwise keep
    # (E, 1) and let the kernel do the (hidden-under-DMA) lane broadcast.
    if E * Nt * isz_out <= _ROW_BCAST_MAX_BYTES:
        row2d = jnp.broadcast_to(row[:, None], (E, Nt))
    else:
        row2d = row[:, None]
    Rw = row2d.shape[1]

    bytes_accessed = int(G * M * N * isz_in + G * (M + E) * N * isz_out
                         + E * Rw * isz_out)

    return pl.pallas_call(
        _concat_sublane_kernel,
        out_shape=jax.ShapeDtypeStruct((G, M + E, N), out_dtype),
        grid_spec=pl.GridSpec(
            grid=grid,
            in_specs=[
                pl.BlockSpec((Gt, M, Nt), lambda g, n: (g, 0, n)),
                pl.BlockSpec((E, Rw), lambda g, n: (0, 0)),
            ],
            out_specs=pl.BlockSpec((Gt, M + E, Nt), lambda g, n: (g, 0, n)),
        ),
        compiler_params=pltpu.CompilerParams(
            dimension_semantics=("parallel", "parallel"),
            vmem_limit_bytes=vmem_limit),
        cost_estimate=pl.CostEstimate(
            flops=0, transcendentals=0, bytes_accessed=bytes_accessed),
    )(x, row2d)


def _concat_lane(x, row):
    """x: (G, M, N) native dtype; row: (Er,) promoted dtype.
    Returns (G, M, N+Er); the embedding lanes are constant along G and M."""
    G, M, N = x.shape
    Er = row.shape[0]
    out_dtype = row.dtype
    step_budget, vmem_limit = _tpu_budgets()

    isz_in = x.dtype.itemsize
    isz_out = jnp.dtype(out_dtype).itemsize
    per_row = N * isz_in + (N + Er) * isz_out      # in+out bytes per sublane row
    per_group = M * per_row

    # Tile the sublane (M) axis only when a single group exceeds the budget.
    Mt = M
    if per_group > step_budget and M >= 64:
        Mt = min(M, max(32, (step_budget // max(per_row, 1)) // 32 * 32))
    Gt = _pick_group_tile(G, Mt * per_row, step_budget)
    grid = (pl.cdiv(G, Gt), pl.cdiv(M, Mt))

    if Mt * Er * isz_out <= _ROW_BCAST_MAX_BYTES:
        row2d = jnp.broadcast_to(row[None, :], (Mt, Er))
    else:
        row2d = row[None, :]
    Rm = row2d.shape[0]

    bytes_accessed = int(G * M * N * isz_in + G * M * (N + Er) * isz_out
                         + Rm * Er * isz_out)

    return pl.pallas_call(
        _concat_lane_kernel,
        out_shape=jax.ShapeDtypeStruct((G, M, N + Er), out_dtype),
        grid_spec=pl.GridSpec(
            grid=grid,
            in_specs=[
                pl.BlockSpec((Gt, Mt, N), lambda g, m: (g, m, 0)),
                pl.BlockSpec((Rm, Er), lambda g, m: (0, 0)),
            ],
            out_specs=pl.BlockSpec((Gt, Mt, N + Er), lambda g, m: (g, m, 0)),
        ),
        compiler_params=pltpu.CompilerParams(
            dimension_semantics=("parallel", "parallel"),
            vmem_limit_bytes=vmem_limit),
        cost_estimate=pl.CostEstimate(
            flops=0, transcendentals=0, bytes_accessed=bytes_accessed),
    )(x, row2d)


# ---------------------------------------------------------------------------
# Forward pass
# ---------------------------------------------------------------------------

def langid_embed_concat(x, weight, view_idx, concat_dim=1):
    """x: (B, C, H, W); weight: (L, E); returns x with the embedding row
    weight[view_idx] broadcast and concatenated along concat_dim."""
    assert x.ndim == 4, "expected NCHW input"
    assert concat_dim <= 3, "concat_dim cannot be greater than the dim of the input (3)"
    assert concat_dim >= 1, "concat_dim cannot equal the batch dim (0)"
    B, C, H, W = x.shape
    E = weight.shape[1]

    # torch.cat / jnp.concatenate dtype promotion; x itself stays native and is
    # cast per-tile inside the kernel (no wrapper-wide astype pass over x).
    out_dtype = jnp.promote_types(x.dtype, weight.dtype)
    row = weight[jnp.asarray(view_idx, jnp.int32)].astype(out_dtype)   # (E,)

    if concat_dim == 1:
        if H * W >= _LANE_DENSE_MIN:
            out = _concat_sublane(x.reshape(B, C, H * W), row)         # (B, C+E, H*W)
        else:
            # Tiny spatial extent: flatten (C,H,W) onto lanes and append the
            # pre-repeated row so every store is lane-dense.
            row_rep = jnp.repeat(row, H * W)                           # (E*H*W,)
            out = _concat_lane(x.reshape(1, B, C * H * W), row_rep)    # (1, B, (C+E)*H*W)
        return out.reshape(B, C + E, H, W)

    if concat_dim == 2:
        if W >= _LANE_DENSE_MIN:
            out = _concat_sublane(x.reshape(B * C, H, W), row)         # (B*C, H+E, W)
        else:
            # Small W: flatten (H,W) onto lanes, append repeat(row, W).
            row_rep = jnp.repeat(row, W)                               # (E*W,)
            out = _concat_lane(x.reshape(B, C, H * W), row_rep)        # (B, C, (H+E)*W)
        return out.reshape(B, C, H + E, W)

    # concat_dim == 3: concat along lanes directly.
    out = _concat_lane(x.reshape(B * C, H, W), row)                    # (B*C, H, W+E)
    return out.reshape(B, C, H, W + E)


class LangIdEmbedder:
    """JAX/Pallas port of the PyTorch LangIdEmbedder module (forward only)."""

    def __init__(self, num_langs, embed_dim, key):
        # nn.Embedding default init: weight ~ N(0, 1), shape (num_langs, embed_dim)
        self.weight = jax.random.normal(
            key, (num_langs, embed_dim), dtype=jnp.float32)

    def __call__(self, x, view_idx, concat_dim=1, first_layer=False):
        # first_layer only detaches the embedding from autograd in PyTorch; it
        # has no effect on forward values.
        # TODO(synk): no autograd detach semantics needed for a forward-only kernel.
        return langid_embed_concat(x, self.weight, view_idx, concat_dim=concat_dim)


def langid_ref(x, weight, view_idx, concat_dim=1):
    """Pure-JAX mirror of the PyTorch forward, for verification."""
    repeat_dims = list(x.shape)
    repeat_dims.pop(concat_dim)
    idxs = jnp.broadcast_to(jnp.asarray(view_idx), tuple(repeat_dims))
    embeds = weight[idxs]  # (..., E)
    if concat_dim < 3:
        embeds = jnp.swapaxes(embeds, 2, 3)
        if concat_dim < 2:
            embeds = jnp.swapaxes(embeds, 1, 2)
    return jnp.concatenate((x, embeds), axis=concat_dim)


if __name__ == "__main__":
    key = jax.random.PRNGKey(0)
    k_x, k_w = jax.random.split(key)

    num_langs, embed_dim = 4, 8
    B, C, H, W = 2, 4, 16, 16
    view_idx = 2

    x = jax.random.normal(k_x, (B, C, H, W), dtype=jnp.float32)
    mod = LangIdEmbedder(num_langs, embed_dim, k_w)

    # concat along channel dim (default path, sublane concat).
    out1 = jax.block_until_ready(mod(x, view_idx, concat_dim=1))
    ref1 = langid_ref(x, mod.weight, view_idx, concat_dim=1)
    assert out1.shape == (B, C + embed_dim, H, W), out1.shape
    assert jnp.allclose(out1, ref1), "mismatch for concat_dim=1"

    # concat along height dim (small W -> lane-densified path).
    out2 = jax.block_until_ready(mod(x, view_idx, concat_dim=2))
    ref2 = langid_ref(x, mod.weight, view_idx, concat_dim=2)
    assert out2.shape == (B, C, H + embed_dim, W), out2.shape
    assert jnp.allclose(out2, ref2), "mismatch for concat_dim=2"

    # concat along width (lane) dim.
    out3 = jax.block_until_ready(mod(x, view_idx, concat_dim=3))
    ref3 = langid_ref(x, mod.weight, view_idx, concat_dim=3)
    assert out3.shape == (B, C, H, W + embed_dim), out3.shape
    assert jnp.allclose(out3, ref3), "mismatch for concat_dim=3"

    # Mixed dtype: bf16 x + f32 table -> f32 output, cast done in-kernel.
    x_bf16 = x.astype(jnp.bfloat16)
    out4 = jax.block_until_ready(mod(x_bf16, view_idx, concat_dim=1))
    ref4 = langid_ref(x_bf16, mod.weight, view_idx, concat_dim=1)
    assert out4.dtype == jnp.float32, out4.dtype
    assert jnp.allclose(out4, ref4, atol=1e-2, rtol=1e-2), "mismatch for bf16 input"

    # Odd, non-power-of-two dims exercise the cdiv grid / ragged handling.
    x_odd = jax.random.normal(k_x, (3, 5, 16, 16), dtype=jnp.float32)
    out5 = jax.block_until_ready(mod(x_odd, 1, concat_dim=1))
    ref5 = langid_ref(x_odd, mod.weight, 1, concat_dim=1)
    assert jnp.allclose(out5, ref5), "mismatch for odd-shaped input"

    print("KERNEL_OK")
</pallas_src>

<mosaic_0001>
module attributes {stable_mosaic.version = 11 : i64} {
  func.func @_concat_sublane_kernel(%arg0: i32, %arg1: i32, %arg2: memref<2x4x256xf32, #tpu.memory_space<vmem>>, %arg3: memref<8x256xf32, #tpu.memory_space<vmem>>, %arg4: memref<2x12x256xf32, #tpu.memory_space<vmem>>) attributes {dimension_semantics = [#tpu.dimension_semantics<parallel>, #tpu.dimension_semantics<parallel>], iteration_bounds = array<i64: 1, 1>, scalar_prefetch = 0 : i64, scratch_operands = 0 : i64, tpu.core_type = #tpu.core_type<tc>, window_params = [{transform_indices = @transform_0, window_bounds = array<i64: 2, 4, 256>}, {pipeline_mode = #tpu.pipeline_mode<synchronous>, transform_indices = @transform_1, window_bounds = array<i64: 8, 256>}, {transform_indices = @transform_2, window_bounds = array<i64: 2, 12, 256>}]} {
    %c0 = arith.constant 0 : index
    %c0_0 = arith.constant 0 : index
    %c0_1 = arith.constant 0 : index
    %0 = vector.load %arg2[%c0, %c0_0, %c0_1] : memref<2x4x256xf32, #tpu.memory_space<vmem>>, vector<2x4x256xf32>
    %c0_2 = arith.constant 0 : index
    %c0_3 = arith.constant 0 : index
    %1 = vector.load %arg3[%c0_2, %c0_3] : memref<8x256xf32, #tpu.memory_space<vmem>>, vector<8x256xf32>
    %2 = vector.shape_cast %1 : vector<8x256xf32> to vector<1x8x256xf32>
    %3 = vector.shape_cast %2 : vector<1x8x256xf32> to vector<1x8x256xf32>
    %4 = vector.broadcast %3 : vector<1x8x256xf32> to vector<2x8x256xf32>
    %5 = tpu.concatenate %0, %4 in 1 : vector<2x4x256xf32>, vector<2x8x256xf32> -> vector<2x12x256xf32>
    %c0_4 = arith.constant 0 : index
    %c0_5 = arith.constant 0 : index
    %c0_6 = arith.constant 0 : index
    %6 = vector.load %arg4[%c0_4, %c0_5, %c0_6] : memref<2x12x256xf32, #tpu.memory_space<vmem>>, vector<2x12x256xf32>
    tpu.vector_store %arg4[%c0_4, %c0_5, %c0_6], %5 {strides = array<i32>} : memref<2x12x256xf32, #tpu.memory_space<vmem>>, vector<2x12x256xf32>,
    return
  }
  func.func @transform_0(%arg0: i32, %arg1: i32) -> (i32, i32, i32) {
    %c0_i32 = arith.constant 0 : i32
    %c0_i32_0 = arith.constant 0 : i32
    return %arg0, %c0_i32, %arg1 : i32, i32, i32
  }
  func.func @transform_1(%arg0: i32, %arg1: i32) -> (i32, i32) {
    %c0_i32 = arith.constant 0 : i32
    %c0_i32_0 = arith.constant 0 : i32
    %c0_i32_1 = arith.constant 0 : i32
    return %c0_i32, %c0_i32_0 : i32, i32
  }
  func.func @transform_2(%arg0: i32, %arg1: i32) -> (i32, i32, i32) {
    %c0_i32 = arith.constant 0 : i32
    %c0_i32_0 = arith.constant 0 : i32
    return %arg0, %c0_i32, %arg1 : i32, i32, i32
  }
}

</mosaic_0001>

<bundles_post_ra>
// kernel: tpu_custom_call.1
= control target key start
LH: loop header
LB: loop body
LE: loop exit
PB: predicated region body
PF: predicated region fallthrough
CT: control target
= control target key end

     0   :  { %7 = vsyncpa [#allocation3], 0  ;;  %s197_s0 = inlined_call_operand.hbm [shape: f32[2,4,256], index: 0, kind: input, shape index: {}]   ;;  %s198_s1 = inlined_call_operand.hbm [shape: f32[8,256], index: 1, kind: input, shape index: {}]   ;;  %s199_s2 = inlined_call_operand.vmem [shape: f32[2,12,256], index: 2, kind: output, shape index: {}]  }
   0x1   :  { %8 = vsyncpa [#allocation5], 0  ;;  %s126_s9 = smov [#allocation2]   ;;  %s78_s13 = scalar_lea.hbm %s197_s0, 256 }
   0x2   :  { %s14_s10 = sshll.u32 %s126_s9, 4  ;;  %p79_p0 = scmp.ne.s32.totalorder %s197_s0, %s78_s13  ;;  %s15_s10 = int_to_ptr.vmem [resolvable:$true] %s14_s10 }
   0x3   :  { %p82_p1 = scmp.lt.u32.totalorder %s78_s13, %s197_s0 }
   0x5   :  { %p84_p2 = pnand %p82_p1, %p79_p0 }
   0x7   :  { %87 = shalt.err (!%p84_p2)
}
   0x8   :  { %s88_s18 = scalar_lea.vmem %s15_s10, 256  ;;  %p93_p4 = scmp.lt.s32.totalorder %s15_s10, %s15_s10 }
   0x9   :  { %p89_p3 = scmp.ne.s32.totalorder %s15_s10, %s88_s18  ;;  %p94_p5 = scmp.lt.s32.totalorder %s88_s18, %s88_s18 }
   0xb   :  { %p95_p6 = por %p94_p5, %p93_p4 }
   0xd   :  { %p96_p7 = pnand %p95_p6, %p89_p3 }
   0xf   :  { %99 = shalt.err (!%p96_p7)
}
  0x10   :  { %s127_s19 = smov 128   ;;  %s128_s20 = smov 8  }
  0x11   :  { %20 = dma.hbm_to_vmem [thread:$0]  %s197_s0, 256, %s15_s10, [#allocation3], %s127_s19, %s127_s19, %s128_s20  }
  0x12   :  { %s129_s23 = smov [#allocation4]   ;;  %s100_s27 = scalar_lea.hbm %s198_s1, 256 }
  0x13   :  { %s27_s24 = sshll.u32 %s129_s23, 4  ;;  %p101_p8 = scmp.ne.s32.totalorder %s198_s1, %s100_s27  ;;  %s28_s24 = int_to_ptr.vmem [resolvable:$true] %s27_s24 }
  0x14   :  { %p104_p9 = scmp.lt.u32.totalorder %s100_s27, %s198_s1 }
  0x16   :  { %p106_p10 = pnand %p104_p9, %p101_p8 }
  0x18   :  { %109 = shalt.err (!%p106_p10)
}
  0x19   :  { %s110_s4 = scalar_lea.vmem %s28_s24, 256  ;;  %p115_p12 = scmp.lt.s32.totalorder %s28_s24, %s28_s24 }
  0x1a   :  { %p111_p11 = scmp.ne.s32.totalorder %s28_s24, %s110_s4  ;;  %p116_p13 = scmp.lt.s32.totalorder %s110_s4, %s110_s4 }
  0x1c   :  { %p117_p0 = por %p116_p13, %p115_p12 }
  0x1e   :  { %p118_p1 = pnand %p117_p0, %p111_p11 }
  0x20   :  { %121 = shalt.err (!%p118_p1)
}
  0x21   :  { %30 = dma.hbm_to_vmem [thread:$0]  %s198_s1, 256, %s28_s24, [#allocation5]  }
  0x22   :  { %122 = dma.done.wait [#allocation3], 256  }
  0x23   :  { %123 = vsyncadd [#allocation3], 4294967040 }
  0x24   :  { %124 = dma.done.wait [#allocation5], 256  }
  0x25   :  { %125 = vsyncadd [#allocation5], 4294967040  ;;  %v37_v0 = vld [vmem:[#allocation2] sm:$0xff]  ;;  %v39_v1 = vld [vmem:[#allocation4] sm:$0xff]  ;;  %vm53_vm0 = vcmask 1043456  }
  0x26   :  { %v40_v2 = vld [vmem:[#allocation4 + $0x8] sm:$0xff]  ;;  %v43_v3 = vcombine.high %v37_v0, %v37_v0  ;;  %v49_v4 = vrot.slane %v39_v1, 4  ;;  %v38_v6 = vld [vmem:[#allocation2 + $0x8] sm:$0xff] }
  0x27   :  { %v50_v5 = vrot.slane %v40_v2, 4  ;;  %v44_v7 = vcombine.high %v38_v6, %v38_v6 }
  0x28   :  { %v54_v8 = vsel %vm53_vm0, %v37_v0, %v49_v4  ;;  %60 = vst [vmem:[%s199_s2 + $0x10] sm:$0xf] %v49_v4  ;;  %64 = vst [vmem:[%s199_s2 + $0x30] sm:$0xf] %v49_v4  ;;  %v56_v10 = vsel %vm53_vm0, %v38_v6, %v49_v4 }
  0x29   :  { %v55_v9 = vsel %vm53_vm0, %v43_v3, %v50_v5  ;;  %61 = vst [vmem:[%s199_s2 + $0x18] sm:$0xf] %v50_v5  ;;  %65 = vst [vmem:[%s199_s2 + $0x38] sm:$0xf] %v50_v5  ;;  %v57_v11 = vsel %vm53_vm0, %v44_v7, %v50_v5 }
  0x2a   :  { %58 = vst [vmem:[%s199_s2] sm:$0xff] %v54_v8  ;;  %59 = vst [vmem:[%s199_s2 + $0x8] sm:$0xff] %v55_v9 }
  0x2b   :  { %62 = vst [vmem:[%s199_s2 + $0x20] sm:$0xff] %v56_v10  ;;  %63 = vst [vmem:[%s199_s2 + $0x28] sm:$0xff] %v57_v11 }
  0x2c   :  { %70 = vsyncpa [#allocation3], 1 }
  0x2d   :  { %71 = vsyncpa [#allocation5], 1 }

</bundles_post_ra>
